<compile_context>
chip_gen: v7x
topology: tpu7x:2x2x1
jax: 0.10.0
libtpu: 0.0.40
codegen_flags: <defaults>
</compile_context>

<pallas_src>
import jax
import jax.numpy as jnp
from jax.experimental import pallas as pl
from jax.experimental.pallas import tpu as pltpu

EPS = 1e-5

# Row layout of the packed parameter slab (272 rows x 128 lanes, f32):
#   rows   0..1 : w1 (2, 32)  in lanes 0:32
#   row       2 : gamma1      in lanes 0:32
#   row       3 : beta1       in lanes 0:32
#   row       4 : gamma2      in lanes 0:32
#   row       5 : beta2       in lanes 0:32
#   rows   8..135 : w2 zero-padded to (128, 128)  (w2 at rows 8:40, lanes 0:32)
#   rows 136..263 : w3 zero-padded to (128, 128)  (w3 at rows 136:168, lanes 0:5)
#   row  264      : b3 zero-padded to (1, 128)    (lanes 0:5)
_PV_ROWS = slice(0, 8)
_W2_ROWS = slice(8, 136)
_W3_ROWS = slice(136, 264)
_B3_ROW = slice(264, 265)
_SLAB_ROWS = 272


def _mlp_kernel(x_ref, slab_ref, o_ref):
    x = x_ref[...]                                   # (N, 2) f32

    # One aligned (8,128) vreg load for all per-feature vectors.
    pv = slab_ref[_PV_ROWS, :]                       # (8, 128)
    w1r0, w1r1 = pv[0:1, :], pv[1:2, :]
    g1, be1 = pv[2:3, :], pv[3:4, :]
    g2, be2 = pv[4:5, :], pv[5:6, :]

    # ---- Linear(2, 32) on the VPU: two broadcast FMAs (b1 cancelled by BN) --
    h = x[:, 0:1] * w1r0 + x[:, 1:2] * w1r1          # (N, 128), lanes 32: are 0

    # ---- BatchNorm1d(32) (training-mode stats, centered variance) + Tanh ----
    m1 = jnp.mean(h, axis=0, keepdims=True)
    d1 = h - m1
    v1 = jnp.mean(d1 * d1, axis=0, keepdims=True)
    s1 = g1 * jax.lax.rsqrt(v1 + EPS)
    h = jnp.tanh(d1 * s1 + be1)                      # padded lanes stay exactly 0

    # ---- Linear(32, 32) on the MXU (zero-padded to 128x128; b2 cancelled) ---
    h = jnp.dot(h, slab_ref[_W2_ROWS, :], preferred_element_type=jnp.float32)

    # ---- BatchNorm1d(32) + Tanh ----
    m2 = jnp.mean(h, axis=0, keepdims=True)
    d2 = h - m2
    v2 = jnp.mean(d2 * d2, axis=0, keepdims=True)
    s2 = g2 * jax.lax.rsqrt(v2 + EPS)
    h = jnp.tanh(d2 * s2 + be2)

    # ---- Linear(32, 5) zero-padded to 128 output lanes (lane-dense store) ---
    o_ref[...] = (
        jnp.dot(h, slab_ref[_W3_ROWS, :], preferred_element_type=jnp.float32)
        + slab_ref[_B3_ROW, :]
    )


def pack_params(p):
    """One-time packing of all module parameters into a single (272,128) slab.

    Do this once at setup time (not per forward call).  b1/b2 are intentionally
    not packed: they are exactly cancelled by training-mode BatchNorm.
    """
    slab = jnp.zeros((_SLAB_ROWS, 128), jnp.float32)
    slab = slab.at[0:2, 0:32].set(p["w1"])
    slab = slab.at[2, 0:32].set(p["g1"][0])
    slab = slab.at[3, 0:32].set(p["be1"][0])
    slab = slab.at[4, 0:32].set(p["g2"][0])
    slab = slab.at[5, 0:32].set(p["be2"][0])
    slab = slab.at[8:40, 0:32].set(p["w2"])
    slab = slab.at[136:168, 0:5].set(p["w3"])
    slab = slab.at[264, 0:5].set(p["b3"][0])
    return slab


def mlp_forward(x, slab):
    """x: (N, 2) float32, N >= 2 (training-mode BatchNorm).  slab: pack_params()."""
    N = x.shape[0]
    vmem = pl.BlockSpec(memory_space=pltpu.MemorySpace.VMEM)
    y_full = pl.pallas_call(
        _mlp_kernel,
        out_shape=jax.ShapeDtypeStruct((N, 128), jnp.float32),
        in_specs=[vmem, vmem],
        out_specs=vmem,
    )(x, slab)
    return y_full[:, :5]


def init_params(key):
    """Deterministic synthetic parameters matching the PyTorch module shapes.

    PyTorch Linear weight is (out, in); stored here as (in, out) so the kernel
    does x @ W directly.  b1/b2 are kept only for the pure-JAX reference.
    """
    ks = jax.random.split(key, 10)

    def u(k, shape, scale):
        return jax.random.uniform(k, shape, jnp.float32, -scale, scale)

    return {
        "w1": u(ks[0], (2, 32), (1.0 / 2) ** 0.5),
        "b1": u(ks[1], (1, 32), (1.0 / 2) ** 0.5),
        "g1": 1.0 + 0.1 * jax.random.normal(ks[2], (1, 32), jnp.float32),
        "be1": 0.1 * jax.random.normal(ks[3], (1, 32), jnp.float32),
        "w2": u(ks[4], (32, 32), (1.0 / 32) ** 0.5),
        "b2": u(ks[5], (1, 32), (1.0 / 32) ** 0.5),
        "g2": 1.0 + 0.1 * jax.random.normal(ks[6], (1, 32), jnp.float32),
        "be2": 0.1 * jax.random.normal(ks[7], (1, 32), jnp.float32),
        "w3": u(ks[8], (32, 5), (1.0 / 32) ** 0.5),
        "b3": u(ks[9], (1, 5), (1.0 / 32) ** 0.5),
    }


def mlp_reference(x, p):
    """Pure-JAX reference with full PyTorch semantics (biases included)."""
    h = x @ p["w1"] + p["b1"]
    m = h.mean(0, keepdims=True)
    v = ((h - m) ** 2).mean(0, keepdims=True)
    h = jnp.tanh((h - m) / jnp.sqrt(v + EPS) * p["g1"] + p["be1"])
    h = h @ p["w2"] + p["b2"]
    m = h.mean(0, keepdims=True)
    v = ((h - m) ** 2).mean(0, keepdims=True)
    h = jnp.tanh((h - m) / jnp.sqrt(v + EPS) * p["g2"] + p["be2"])
    return h @ p["w3"] + p["b3"]


if __name__ == "__main__":
    key = jax.random.PRNGKey(0)
    k_x, k_p = jax.random.split(key)

    N = 8  # batch size (BatchNorm1d in training mode needs N > 1)
    x = jax.random.normal(k_x, (N, 2), jnp.float32)
    params = init_params(k_p)
    slab = jax.block_until_ready(pack_params(params))  # one-time packing

    y = jax.jit(mlp_forward)(x, slab)
    y = jax.block_until_ready(y)

    y_ref = mlp_reference(x, params)
    assert y.shape == (N, 5)
    assert jnp.allclose(y, y_ref, atol=1e-4, rtol=1e-4), (y, y_ref)

    print("KERNEL_OK")
</pallas_src>

<mosaic_0001>
module attributes {stable_mosaic.version = 11 : i64} {
  func.func @_mlp_kernel(%arg0: memref<8x2xf32, #tpu.memory_space<vmem>>, %arg1: memref<272x128xf32, #tpu.memory_space<vmem>>, %arg2: memref<8x128xf32, #tpu.memory_space<vmem>>) attributes {dimension_semantics = [], scalar_prefetch = 0 : i64, scratch_operands = 0 : i64, tpu.core_type = #tpu.core_type<tc>} {
    %c0 = arith.constant 0 : index
    %c0_0 = arith.constant 0 : index
    %0 = vector.load %arg0[%c0, %c0_0] : memref<8x2xf32, #tpu.memory_space<vmem>>, vector<8x2xf32>
    %c0_1 = arith.constant 0 : index
    %c0_2 = arith.constant 0 : index
    %1 = vector.load %arg1[%c0_1, %c0_2] : memref<272x128xf32, #tpu.memory_space<vmem>>, vector<8x128xf32>
    %2 = vector.extract_strided_slice %1 {offsets = [0, 0], sizes = [1, 128], strides = [1, 1]} : vector<8x128xf32> to vector<1x128xf32>
    %3 = vector.extract_strided_slice %1 {offsets = [1, 0], sizes = [1, 128], strides = [1, 1]} : vector<8x128xf32> to vector<1x128xf32>
    %4 = vector.extract_strided_slice %1 {offsets = [2, 0], sizes = [1, 128], strides = [1, 1]} : vector<8x128xf32> to vector<1x128xf32>
    %5 = vector.extract_strided_slice %1 {offsets = [3, 0], sizes = [1, 128], strides = [1, 1]} : vector<8x128xf32> to vector<1x128xf32>
    %6 = vector.extract_strided_slice %1 {offsets = [4, 0], sizes = [1, 128], strides = [1, 1]} : vector<8x128xf32> to vector<1x128xf32>
    %7 = vector.extract_strided_slice %1 {offsets = [5, 0], sizes = [1, 128], strides = [1, 1]} : vector<8x128xf32> to vector<1x128xf32>
    %8 = vector.extract_strided_slice %0 {offsets = [0, 0], sizes = [8, 1], strides = [1, 1]} : vector<8x2xf32> to vector<8x1xf32>
    %9 = vector.broadcast %8 : vector<8x1xf32> to vector<8x128xf32>
    %10 = vector.broadcast %2 : vector<1x128xf32> to vector<8x128xf32>
    %11 = arith.mulf %9, %10 : vector<8x128xf32>
    %12 = vector.extract_strided_slice %0 {offsets = [0, 1], sizes = [8, 1], strides = [1, 1]} : vector<8x2xf32> to vector<8x1xf32>
    %13 = vector.broadcast %12 : vector<8x1xf32> to vector<8x128xf32>
    %14 = vector.broadcast %3 : vector<1x128xf32> to vector<8x128xf32>
    %15 = arith.mulf %13, %14 : vector<8x128xf32>
    %16 = arith.addf %11, %15 : vector<8x128xf32>
    %cst = arith.constant dense<0.000000e+00> : vector<128xf32>
    %17 = vector.multi_reduction <add>, %16, %cst [0] : vector<8x128xf32> to vector<128xf32>
    %18 = vector.shape_cast %17 : vector<128xf32> to vector<1x128xf32>
    %cst_3 = arith.constant 8.000000e+00 : f32
    %19 = vector.broadcast %cst_3 : f32 to vector<1x128xf32>
    %20 = arith.divf %18, %19 : vector<1x128xf32>
    %21 = vector.broadcast %20 : vector<1x128xf32> to vector<8x128xf32>
    %22 = arith.subf %16, %21 : vector<8x128xf32>
    %23 = arith.mulf %22, %22 : vector<8x128xf32>
    %cst_4 = arith.constant dense<0.000000e+00> : vector<128xf32>
    %24 = vector.multi_reduction <add>, %23, %cst_4 [0] : vector<8x128xf32> to vector<128xf32>
    %25 = vector.shape_cast %24 : vector<128xf32> to vector<1x128xf32>
    %cst_5 = arith.constant 8.000000e+00 : f32
    %26 = vector.broadcast %cst_5 : f32 to vector<1x128xf32>
    %27 = arith.divf %25, %26 : vector<1x128xf32>
    %cst_6 = arith.constant 9.99999974E-6 : f32
    %28 = vector.broadcast %cst_6 : f32 to vector<1x128xf32>
    %29 = arith.addf %27, %28 : vector<1x128xf32>
    %30 = math.rsqrt %29 : vector<1x128xf32>
    %31 = arith.mulf %4, %30 : vector<1x128xf32>
    %32 = vector.broadcast %31 : vector<1x128xf32> to vector<8x128xf32>
    %33 = arith.mulf %22, %32 : vector<8x128xf32>
    %34 = vector.broadcast %5 : vector<1x128xf32> to vector<8x128xf32>
    %35 = arith.addf %33, %34 : vector<8x128xf32>
    %36 = math.tanh %35 : vector<8x128xf32>
    %c8 = arith.constant 8 : index
    %c0_7 = arith.constant 0 : index
    %37 = vector.load %arg1[%c8, %c0_7] : memref<272x128xf32, #tpu.memory_space<vmem>>, vector<128x128xf32>
    %cst_8 = arith.constant dense<0.000000e+00> : vector<8x128xf32>
    %38 = tpu.matmul %36, %37, %cst_8 {dimension_numbers = #tpu.dot_dimension_numbers<[1], [0], [0], [1], [0, 0, 1, 1], [], []>} : vector<8x128xf32>, vector<128x128xf32>, vector<8x128xf32> -> vector<8x128xf32>
    %cst_9 = arith.constant dense<0.000000e+00> : vector<128xf32>
    %39 = vector.multi_reduction <add>, %38, %cst_9 [0] : vector<8x128xf32> to vector<128xf32>
    %40 = vector.shape_cast %39 : vector<128xf32> to vector<1x128xf32>
    %cst_10 = arith.constant 8.000000e+00 : f32
    %41 = vector.broadcast %cst_10 : f32 to vector<1x128xf32>
    %42 = arith.divf %40, %41 : vector<1x128xf32>
    %43 = vector.broadcast %42 : vector<1x128xf32> to vector<8x128xf32>
    %44 = arith.subf %38, %43 : vector<8x128xf32>
    %45 = arith.mulf %44, %44 : vector<8x128xf32>
    %cst_11 = arith.constant dense<0.000000e+00> : vector<128xf32>
    %46 = vector.multi_reduction <add>, %45, %cst_11 [0] : vector<8x128xf32> to vector<128xf32>
    %47 = vector.shape_cast %46 : vector<128xf32> to vector<1x128xf32>
    %cst_12 = arith.constant 8.000000e+00 : f32
    %48 = vector.broadcast %cst_12 : f32 to vector<1x128xf32>
    %49 = arith.divf %47, %48 : vector<1x128xf32>
    %cst_13 = arith.constant 9.99999974E-6 : f32
    %50 = vector.broadcast %cst_13 : f32 to vector<1x128xf32>
    %51 = arith.addf %49, %50 : vector<1x128xf32>
    %52 = math.rsqrt %51 : vector<1x128xf32>
    %53 = arith.mulf %6, %52 : vector<1x128xf32>
    %54 = vector.broadcast %53 : vector<1x128xf32> to vector<8x128xf32>
    %55 = arith.mulf %44, %54 : vector<8x128xf32>
    %56 = vector.broadcast %7 : vector<1x128xf32> to vector<8x128xf32>
    %57 = arith.addf %55, %56 : vector<8x128xf32>
    %58 = math.tanh %57 : vector<8x128xf32>
    %c136 = arith.constant 136 : index
    %c0_14 = arith.constant 0 : index
    %59 = vector.load %arg1[%c136, %c0_14] : memref<272x128xf32, #tpu.memory_space<vmem>>, vector<128x128xf32>
    %cst_15 = arith.constant dense<0.000000e+00> : vector<8x128xf32>
    %60 = tpu.matmul %58, %59, %cst_15 {dimension_numbers = #tpu.dot_dimension_numbers<[1], [0], [0], [1], [0, 0, 1, 1], [], []>} : vector<8x128xf32>, vector<128x128xf32>, vector<8x128xf32> -> vector<8x128xf32>
    %c264 = arith.constant 264 : index
    %c0_16 = arith.constant 0 : index
    %61 = vector.load %arg1[%c264, %c0_16] : memref<272x128xf32, #tpu.memory_space<vmem>>, vector<1x128xf32>
    %62 = vector.broadcast %61 : vector<1x128xf32> to vector<8x128xf32>
    %63 = arith.addf %60, %62 : vector<8x128xf32>
    %c0_17 = arith.constant 0 : index
    %c0_18 = arith.constant 0 : index
    %64 = vector.load %arg2[%c0_17, %c0_18] : memref<8x128xf32, #tpu.memory_space<vmem>>, vector<8x128xf32>
    tpu.vector_store %arg2[%c0_17, %c0_18], %63 {strides = array<i32>} : memref<8x128xf32, #tpu.memory_space<vmem>>, vector<8x128xf32>,
    return
  }
}

</mosaic_0001>

<bundles_post_ra>
// kernel: mlp_forward.1
= control target key start
LH: loop header
LB: loop body
LE: loop exit
PB: predicated region body
PF: predicated region fallthrough
CT: control target
= control target key end

     0   :  { %7 = vsyncpa [#allocation3], 0  ;;  %s605_s0 = inlined_call_operand.vmem [shape: f32[8,2], index: 0, kind: input, shape index: {}]   ;;  %s606_s1 = inlined_call_operand.hbm [shape: f32[272,128], index: 1, kind: input, shape index: {}]   ;;  %s607_s2 = inlined_call_operand.hbm [shape: f32[8,128], index: 2, kind: output, shape index: {}]  }
   0x1   :  { %8 = vsyncpa [#allocation4], 0  ;;  %s522_s9 = smov [#allocation2]   ;;  %s474_s13 = scalar_lea.hbm %s606_s1, 4352 }
   0x2   :  { %s16_s10 = sshll.u32 %s522_s9, 4  ;;  %p475_p0 = scmp.ne.s32.totalorder %s606_s1, %s474_s13  ;;  %s17_s10 = int_to_ptr.vmem [resolvable:$true] %s16_s10 }
   0x3   :  { %p478_p1 = scmp.lt.u32.totalorder %s474_s13, %s606_s1 }
   0x5   :  { %p480_p2 = pnand %p478_p1, %p475_p0 }
   0x7   :  { %483 = shalt.err (!%p480_p2)
}
   0x8   :  { %s484_s18 = scalar_lea.vmem %s17_s10, 4352  ;;  %p489_p4 = scmp.lt.s32.totalorder %s17_s10, %s17_s10 }
   0x9   :  { %p485_p3 = scmp.ne.s32.totalorder %s17_s10, %s484_s18  ;;  %p490_p5 = scmp.lt.s32.totalorder %s484_s18, %s484_s18 }
   0xb   :  { %p491_p6 = por %p490_p5, %p489_p4 }
   0xd   :  { %p492_p7 = pnand %p491_p6, %p485_p3 }
   0xf   :  { %495 = shalt.err (!%p492_p7)
}
  0x10   :  { %s523_s19 = smov 128   ;;  %s524_s20 = smov 8  }
  0x11   :  { %22 = dma.hbm_to_vmem [thread:$0]  %s606_s1, 4352, %s17_s10, [#allocation3], %s523_s19, %s523_s19, %s524_s20  }
  0x12   :  { %518 = dma.done.wait [#allocation3], 4352  }
  0x13   :  { %519 = vsyncadd [#allocation3], 4294962944  ;;  %v525_v0 = vmov 0   ;;  %v26_v1 = vld [vmem:[%s605_s0] sm:$0xff]  ;;  %v526_v2 = vmov 1   ;;  %v79_v3 = vld [vmem:[#allocation2 + $0x8] sm:$0xff]  ;;  %v33_v29 = vlaneseq }
  0x14   :  { %464 = vset.pattern.permute.xlu0 %v525_v0  ;;  %v80_v4 = vld [vmem:[#allocation2 + $0x10] sm:$0xff]  ;;  %v527_v6 = vmov 0.0|0.0   ;;  %v81_v7 = vld [vmem:[#allocation2 + $0x18] sm:$0xff]  ;;  %v82_v8 = vld [vmem:[#allocation2 + $0x20] sm:$0xff]  ;;  %vm528_vm0 = vmmov 0   ;;  %v529_v27 = vmov 0.0  }
  0x15   :  { %30 = vperm.xlu0 %464, %v26_v1   ;;  %v408_v5 = vpack.c.bf16 %v80_v4, %v79_v3  ;;  %407 = vmatprep.subr.bf16.mxu0 %v527_v6  ;;  %v411_v9 = vpack.c.bf16 %v82_v8, %v81_v7  ;;  %v83_v10 = vld [vmem:[#allocation2 + $0x28] sm:$0xff]  ;;  %v84_v11 = vld [vmem:[#allocation2 + $0x30] sm:$0xff]  ;;  %v85_v13 = vld [vmem:[#allocation2 + $0x38] sm:$0xff]  ;;  %v570_v30 = vshrl.u32 %v33_v29, 7  ;;  %s530_s0 = smov [#allocation5]  }
  0x16   :  { %431 = vmatprep.subr.bf16.mxu1 %v527_v6  ;;  %v414_v12 = vpack.c.bf16 %v84_v11, %v83_v10  ;;  %v86_v14 = vld [vmem:[#allocation2 + $0x40] sm:$0xff]  ;;  %v87_v16 = vld [vmem:[#allocation2 + $0x48] sm:$0xff]  ;;  %v88_v17 = vld [vmem:[#allocation2 + $0x50] sm:$0xff]  ;;  %369 = vmatprep.mubr.msk.f32.mxu0 %vm528_vm0, %v529_v27  ;;  %s293_s1 = sshll.u32 %s530_s0, 4  ;;  %s294_s1 = int_to_ptr.vmem [resolvable:$true] %s293_s1 }
  0x17   :  { %409 = vmatpush3.bf16.msra.mxu0 %v408_v5  ;;  %v417_v15 = vpack.c.bf16 %v86_v14, %v85_v13  ;;  %v420_v18 = vpack.c.bf16 %v88_v17, %v87_v16  ;;  %v89_v19 = vld [vmem:[#allocation2 + $0x58] sm:$0xff]  ;;  %v90_v20 = vld [vmem:[#allocation2 + $0x60] sm:$0xff]  ;;  %v91_v22 = vld [vmem:[#allocation2 + $0x68] sm:$0xff]  ;;  %404 = vmatprep.mubr.msk.f32.mxu1 %vm528_vm0, %v529_v27  ;;  %v35_v31 = vsub.s32 0, %v570_v30  ;;  %v44_v32 = vsub.s32 1, %v570_v30  ;;  %s496_s25 = scalar_lea.vmem %s294_s1, 128  ;;  %p501_p9 = scmp.lt.s32.totalorder %s294_s1, %s294_s1 }
  0x18   :  { %410 = vmatprep.subr.bf16.mxu0 %v527_v6  ;;  %v423_v21 = vpack.c.bf16 %v90_v20, %v89_v19  ;;  %v92_v23 = vld [vmem:[#allocation2 + $0x70] sm:$0xff]  ;;  %v93_v25 = vld [vmem:[#allocation2 + $0x78] sm:$0xff]  ;;  %v94_v26 = vld [vmem:[#allocation2 + $0x80] sm:$0xff]  ;;  %v70_v58 = vsub.s32 2, %v570_v30  ;;  %v75_v59 = vsub.s32 3, %v570_v30  ;;  %p497_p8 = scmp.ne.s32.totalorder %s294_s1, %s496_s25  ;;  %p502_p10 = scmp.lt.s32.totalorder %s496_s25, %s496_s25 }
  0x19   :  { %465 = vset.pattern.permute.xlu0 %v526_v2  ;;  %v426_v24 = vpack.c.bf16 %v92_v23, %v91_v22  ;;  %v429_v28 = vpack.c.bf16 %v94_v26, %v93_v25  ;;  %v574_v33 = vld [vmem:[#allocation2] sm:$0xff]  ;;  %v195_v3 = vld [vmem:[#allocation2 + $0x88] sm:$0xff]  ;;  %v196_v4 = vld [vmem:[#allocation2 + $0x90] sm:$0xff] }
  0x1a   :  { %39 = vperm.xlu0 %465, %v26_v1   ;;  %v36_v35 = vrot.slane %v574_v33, %v35_v31  ;;  %v45_v36 = vrot.slane %v574_v33, %v44_v32  ;;  %v76_v62 = vrot.slane %v574_v33, %v75_v59  ;;  %v432_v5 = vpack.c.bf16 %v196_v4, %v195_v3  ;;  %v197_v7 = vld [vmem:[#allocation2 + $0x98] sm:$0xff]  ;;  %v198_v8 = vld [vmem:[#allocation2 + $0xa0] sm:$0xff]  ;;  %v199_v10 = vld [vmem:[#allocation2 + $0xa8] sm:$0xff]  ;;  %p503_p11 = por %p502_p10, %p501_p9 }
  0x1b   :  { %412 = vmatpush3.bf16.msra.mxu0 %v411_v9  ;;  %v435_v9 = vpack.c.bf16 %v198_v8, %v197_v7  ;;  %v200_v11 = vld [vmem:[#allocation2 + $0xb0] sm:$0xff]  ;;  %v201_v13 = vld [vmem:[#allocation2 + $0xb8] sm:$0xff]  ;;  %v202_v14 = vld [vmem:[#allocation2 + $0xc0] sm:$0xff] }
  0x1c   :  { %413 = vmatprep.subr.bf16.mxu0 %v527_v6  ;;  %433 = vmatpush3.bf16.msra.mxu1 %v432_v5  ;;  %v203_v16 = vld [vmem:[#allocation2 + $0xc8] sm:$0xff]  ;;  %v204_v17 = vld [vmem:[#allocation2 + $0xd0] sm:$0xff]  ;;  %v205_v19 = vld [vmem:[#allocation2 + $0xd8] sm:$0xff]  ;;  %p504_p12 = pnand %p503_p11, %p497_p8 }
  0x1d   :  { %434 = vmatprep.subr.bf16.mxu1 %v527_v6  ;;  %v206_v20 = vld [vmem:[#allocation2 + $0xe0] sm:$0xff]  ;;  %v207_v22 = vld [vmem:[#allocation2 + $0xe8] sm:$0xff]  ;;  %v208_v23 = vld [vmem:[#allocation2 + $0xf0] sm:$0xff] }
  0x1e   :  { %v209_v25 = vld [vmem:[#allocation2 + $0xf8] sm:$0xff]  ;;  %v210_v26 = vld [vmem:[#allocation2 + $0x100] sm:$0xff] }
  0x1f   :  { %415 = vmatpush3.bf16.msra.mxu0 %v414_v12  ;;  %v438_v12 = vpack.c.bf16 %v200_v11, %v199_v10  ;;  %v453_v27 = vpack.c.bf16 %v210_v26, %v209_v25 }
  0x20   :  { %416 = vmatprep.subr.bf16.mxu0 %v527_v6  ;;  %436 = vmatpush3.bf16.msra.mxu1 %v435_v9 }
  0x21   :  { %437 = vmatprep.subr.bf16.mxu1 %v527_v6 }
  0x23   :  { %418 = vmatpush3.bf16.msra.mxu0 %v417_v15  ;;  %v441_v15 = vpack.c.bf16 %v202_v14, %v201_v13 }
  0x24   :  { %419 = vmatprep.subr.bf16.mxu0 %v527_v6  ;;  %439 = vmatpush3.bf16.msra.mxu1 %v438_v12 }
  0x25   :  { %440 = vmatprep.subr.bf16.mxu1 %v527_v6 }
  0x27   :  { %421 = vmatpush3.bf16.msra.mxu0 %v420_v18  ;;  %v444_v18 = vpack.c.bf16 %v204_v17, %v203_v16 }
  0x28   :  { %422 = vmatprep.subr.bf16.mxu0 %v527_v6  ;;  %442 = vmatpush3.bf16.msra.mxu1 %v441_v15 }
  0x29   :  { %443 = vmatprep.subr.bf16.mxu1 %v527_v6 }
  0x2b   :  { %424 = vmatpush3.bf16.msra.mxu0 %v423_v21  ;;  %v447_v21 = vpack.c.bf16 %v206_v20, %v205_v19 }
  0x2c   :  { %425 = vmatprep.subr.bf16.mxu0 %v527_v6  ;;  %445 = vmatpush3.bf16.msra.mxu1 %v444_v18 }
  0x2d   :  { %446 = vmatprep.subr.bf16.mxu1 %v527_v6 }
  0x2f   :  { %427 = vmatpush3.bf16.msra.mxu0 %v426_v24  ;;  %v450_v24 = vpack.c.bf16 %v208_v23, %v207_v22 }
  0x30   :  { %428 = vmatprep.subr.bf16.mxu0 %v527_v6  ;;  %448 = vmatpush3.bf16.msra.mxu1 %v447_v21 }
  0x31   :  { %449 = vmatprep.subr.bf16.mxu1 %v527_v6 }
  0x33   :  { %430 = vmatpush3.bf16.msra.mxu0 %v429_v28 }
  0x34   :  { %451 = vmatpush3.bf16.msra.mxu1 %v450_v24 }
  0x35   :  { %452 = vmatprep.subr.bf16.mxu1 %v527_v6 }
  0x38   :  { %454 = vmatpush3.bf16.msra.mxu1 %v453_v27 }
  0x94   :  { %v31_v34 = vpop.permute.xlu0 %30 }
  0x95   :  { %v37_v38 = vmul.f32 %v36_v35, %v31_v34 }
  0x99   :  { %v40_v37 = vpop.permute.xlu0 %39 }
  0x9a   :  { %v46_v39 = vmul.f32 %v45_v36, %v40_v37 }
  0x9c   :  { %v47_v40 = vadd.f32 %v46_v39, %v37_v38 }
  0x9e   :  { %v48_v41 = vrot.slane %v47_v40, 4 }
  0xa0   :  { %v49_v42 = vadd.f32 %v48_v41, %v47_v40 }
  0xa2   :  { %v50_v43 = vrot.slane %v49_v42, 2 }
  0xa4   :  { %v51_v44 = vadd.f32 %v50_v43, %v49_v42 }
  0xa6   :  { %v52_v45 = vrot.slane %v51_v44, 1 }
  0xa8   :  { %v53_v46 = vadd.f32 %v52_v45, %v51_v44 }
  0xaa   :  { %v55_v47 = vmul.f32 0.125, %v53_v46 }
  0xac   :  { %v56_v48 = vsub.f32 %v47_v40, %v55_v47 }
  0xae   :  { %v57_v49 = vmul.f32 %v56_v48, %v56_v48 }
  0xb0   :  { %v58_v50 = vrot.slane %v57_v49, 4 }
  0xb2   :  { %v59_v51 = vadd.f32 %v58_v50, %v57_v49  ;;  %v191_v49 = vsub.s32 5, %v570_v30 }
  0xb4   :  { %v60_v52 = vrot.slane %v59_v51, 2 }
  0xb6   :  { %v61_v53 = vadd.f32 %v60_v52, %v59_v51 }
  0xb8   :  { %v62_v54 = vrot.slane %v61_v53, 1 }
  0xba   :  { %v63_v55 = vadd.f32 %v62_v54, %v61_v53  ;;  %v192_v53 = vrot.slane %v574_v33, %v191_v49 }
  0xbc   :  { %v64_v56 = vmul.f32 0.125, %v63_v55 }
  0xbe   :  { %v65_v57 = vadd.f32 1e-05, %v64_v56 }
  0xc0   :  { %466 = vrsqrt.f32 %v65_v57  ;;  %v302_v57 = vld [vmem:[#allocation2 + $0x108] ss:$0 sm:$0xff] }
  0xca   :  { %v467_v60 = vpop.eup %466 }
  0xcb   :  { %v67_v61 = vmul.f32 %v467_v60, %v574_v33 }
  0xcd   :  { %v71_v63 = vrot.slane %v67_v61, %v70_v58 }
  0xcf   :  { %v72_v0 = vmul.f32 %v71_v63, %v56_v48  ;;  %v186_v48 = vsub.s32 4, %v570_v30 }
  0xd1   :  { %v77_v1 = vadd.f32 %v76_v62, %v72_v0 }
  0xd3   :  { %468 = vtanh.f32 %v77_v1 }
  0xdd   :  { %v469_v2 = vpop.eup %468 }
  0xde   :  { %370 = vmatmul.mubr.f32.vlgmr.msra.gmra.mrb[0].mxu0 %v469_v2 }
 0x1b1   :  { %v161_v28 = vpop.f32.mrb[0].mxu0 }
 0x1b2   :  { %v165_v29 = vrot.slane %v161_v28, 4  ;;  %v371_v31 = vpop.f32.mrb[1].mxu0 }
 0x1b4   :  { %v166_v32 = vadd.f32 %v165_v29, %v161_v28 }
 0x1b6   :  { %v167_v34 = vrot.slane %v166_v32, 2 }
 0x1b8   :  { %v168_v35 = vadd.f32 %v167_v34, %v166_v32 }
 0x1ba   :  { %v169_v36 = vrot.slane %v168_v35, 1 }
 0x1bc   :  { %v170_v37 = vadd.f32 %v169_v36, %v168_v35 }
 0x1be   :  { %v171_v38 = vmul.f32 0.125, %v170_v37 }
 0x1c0   :  { %v172_v39 = vsub.f32 %v161_v28, %v171_v38 }
 0x1c2   :  { %v173_v40 = vmul.f32 %v172_v39, %v172_v39 }
 0x1c4   :  { %v174_v41 = vrot.slane %v173_v40, 4 }
 0x1c6   :  { %v175_v42 = vadd.f32 %v174_v41, %v173_v40 }
 0x1c8   :  { %v176_v43 = vrot.slane %v175_v42, 2 }
 0x1ca   :  { %v177_v44 = vadd.f32 %v176_v43, %v175_v42 }
 0x1cc   :  { %v178_v45 = vrot.slane %v177_v44, 1 }
 0x1ce   :  { %v179_v46 = vadd.f32 %v178_v45, %v177_v44 }
 0x1d0   :  { %v180_v47 = vmul.f32 0.125, %v179_v46 }
 0x1d2   :  { %v181_v6 = vadd.f32 1e-05, %v180_v47 }
 0x1d4   :  { %470 = vrsqrt.f32 %v181_v6 }
 0x1de   :  { %v471_v50 = vpop.eup %470 }
 0x1df   :  { %v183_v51 = vmul.f32 %v471_v50, %v574_v33 }
 0x1e1   :  { %v187_v52 = vrot.slane %v183_v51, %v186_v48 }
 0x1e3   :  { %v188_v54 = vmul.f32 %v187_v52, %v172_v39 }
 0x1e5   :  { %v193_v55 = vadd.f32 %v192_v53, %v188_v54 }
 0x1e7   :  { %472 = vtanh.f32 %v193_v55 }
 0x1f1   :  { %v473_v56 = vpop.eup %472 }
 0x1f2   :  { %405 = vmatmul.mubr.f32.vlgmr.msra.gmra.mrb[0].mxu1 %v473_v56 }
 0x2c5   :  { %v282_v58 = vpop.f32.mrb[0].mxu1 }
 0x2c6   :  { %v283_v59 = vadd.f32 %v302_v57, %v282_v58  ;;  %v406_v60 = vpop.f32.mrb[1].mxu1 }
 0x2c8   :  { %286 = vst [vmem:[#allocation5] sm:$0xff] %v283_v59 }
 0x2c9   :  { %507 = shalt.err (!%p504_p12)
}
 0x2ca   :  { %s508_s28 = scalar_lea.hbm %s607_s2, 128 }
 0x2cb   :  { %p509_p13 = scmp.ne.s32.totalorder %s607_s2, %s508_s28  ;;  %p512_p0 = scmp.lt.u32.totalorder %s508_s28, %s607_s2 }
 0x2cd   :  { %p514_p1 = pnand %p512_p0, %p509_p13 }
 0x2cf   :  { %517 = shalt.err (!%p514_p1)
}
 0x2d0   :  { %296 = dma.vmem_to_hbm [thread:$0]  %s294_s1, 128, %s607_s2, [#allocation4]  }
 0x2d1   :  { %520 = dma.done.wait [#allocation4], 128  }
 0x2d2   :  { %521 = vsyncadd [#allocation4], 4294967168 }
 0x2d3   :  { %300 = vsyncpa [#allocation3], 1 }
 0x2d4   :  { %301 = vsyncpa [#allocation4], 1 }

</bundles_post_ra>
